<compile_context>
chip_gen: v6e
topology: v6e:2x2x1
jax: 0.10.0
libtpu: 0.0.40
codegen_flags: <defaults>
</compile_context>

<pallas_src>
import functools

import jax
import jax.numpy as jnp
from jax import lax
from jax.experimental import pallas as pl
from jax.experimental.pallas import tpu as pltpu


def _huber_kernel(p_ref, g_ref, out_ref, acc_ref, *,
                  delta, total_n, rows_valid, needs_mask):
    t = pl.program_id(1)

    @pl.when(t == 0)
    def _():
        acc_ref[...] = jnp.zeros_like(acc_ref)

    # Upcast in vregs only; HBM traffic stays in the native dtype.
    p = p_ref[...].astype(jnp.float32)
    g = g_ref[...].astype(jnp.float32)
    d = p - g
    ad = jnp.abs(d)
    h = jnp.where(ad <= delta, 0.5 * d * d, delta * (ad - 0.5 * delta))

    if needs_mask:
        # Zero out rows of the (possibly partially out-of-bounds) last tile.
        # A couple of extra VALU ops per vreg -- hidden under the DMA stream.
        tile_rows = p_ref.shape[0]
        blk = pl.program_id(0) * pl.num_programs(1) + t
        row0 = blk * tile_rows
        local_row = lax.broadcasted_iota(jnp.int32, h.shape, 0)
        h = jnp.where(row0 + local_row < rows_valid, h, 0.0)

    # Elementwise VPU accumulation into a persistent VMEM accumulator.
    acc_ref[...] += h

    @pl.when(t == pl.num_programs(1) - 1)
    def _():
        # Single XLU reduction per split, then a scalar write to SMEM.
        out_ref[0, 0] = jnp.sum(acc_ref[...]) / jnp.float32(total_n)


def _round_up(x, m):
    return (x + m - 1) // m * m


def huber_loss(predict_y, gt_y, *, delta=1.0, tile_rows_target=1024, lanes=128):
    assert predict_y.shape == gt_y.shape
    total_n = predict_y.size

    p_flat = predict_y.reshape(-1)
    g_flat = gt_y.reshape(-1)

    # Tiny lane pad (<=127 elems) only if total_n is not a multiple of 128.
    # Zero padding in BOTH arrays contributes 0 to the Huber sum; the divisor
    # stays total_n, so the mean is exact.
    rem = total_n % lanes
    if rem:
        pad = lanes - rem
        p_flat = jnp.pad(p_flat, (0, pad))
        g_flat = jnp.pad(g_flat, (0, pad))

    rows = p_flat.size // lanes
    p2 = p_flat.reshape(rows, lanes)
    g2 = g_flat.reshape(rows, lanes)

    # Sublane multiple of the native dtype's (sub, 128) tiling:
    # 8 for 4-byte, 16 for 2-byte, 32 for 1-byte elements.
    itemsize = jnp.dtype(p2.dtype).itemsize
    sub = {4: 8, 2: 16, 1: 32}.get(itemsize, 8)

    # Tile rows: as large as useful, multiple of `sub`. 1024x128 f32 = 512 KiB
    # per buffer; 2 inputs x 2 pipeline buffers + f32 accumulator stays well
    # under the scoped VMEM limit on all generations (v5e/v6e/v7x).
    tile_rows = min(_round_up(tile_rows_target, sub), _round_up(rows, sub))
    num_tiles = -(-rows // tile_rows)

    # Split the reduction into 2 partial sums when it divides evenly, so v7x's
    # two TensorCores can each stream half the rows (no-op on v5e/v6e).
    num_splits = 2 if (num_tiles >= 2 and num_tiles % 2 == 0) else 1
    tiles_per_split = num_tiles // num_splits

    needs_mask = (num_tiles * tile_rows != rows)

    kernel = functools.partial(
        _huber_kernel,
        delta=float(delta),
        total_n=total_n,
        rows_valid=rows,
        needs_mask=needs_mask,
    )

    out = pl.pallas_call(
        kernel,
        out_shape=jax.ShapeDtypeStruct((num_splits, 1), jnp.float32),
        grid_spec=pltpu.PrefetchScalarGridSpec(
            num_scalar_prefetch=0,
            grid=(num_splits, tiles_per_split),
            in_specs=[
                pl.BlockSpec((tile_rows, lanes),
                             lambda s, t: (s * tiles_per_split + t, 0)),
                pl.BlockSpec((tile_rows, lanes),
                             lambda s, t: (s * tiles_per_split + t, 0)),
            ],
            out_specs=pl.BlockSpec((1, 1), lambda s, t: (s, 0),
                                   memory_space=pltpu.SMEM),
            scratch_shapes=[pltpu.VMEM((tile_rows, lanes), jnp.float32)],
        ),
        compiler_params=pltpu.CompilerParams(
            dimension_semantics=("parallel", "arbitrary"),
        ),
    )(p2, g2)

    # Sum per-core partial means -> global mean.
    return jnp.sum(out)


if __name__ == "__main__":
    key = jax.random.PRNGKey(0)
    k1, k2 = jax.random.split(key)
    # NCHW inputs: batch=2, channels=4, spatial=16x16
    predict_y = jax.random.normal(k1, (2, 4, 16, 16), dtype=jnp.float32)
    gt_y = jax.random.normal(k2, (2, 4, 16, 16), dtype=jnp.float32)

    loss = huber_loss(predict_y, gt_y, delta=1.0)
    jax.block_until_ready(loss)

    # Reference: same semantics as nn.HuberLoss(reduction='mean', delta=1.0)
    d = predict_y - gt_y
    ad = jnp.abs(d)
    ref = jnp.mean(jnp.where(ad <= 1.0, 0.5 * d * d, 1.0 * (ad - 0.5 * 1.0)))
    assert jnp.allclose(loss, ref, rtol=1e-6, atol=1e-6), (loss, ref)

    print("KERNEL_OK")
</pallas_src>

<mosaic_0001>
module attributes {stable_mosaic.version = 11 : i64} {
  func.func @_huber_kernel(%arg0: i32, %arg1: i32, %arg2: memref<16x128xf32, #tpu.memory_space<vmem>>, %arg3: memref<16x128xf32, #tpu.memory_space<vmem>>, %arg4: memref<1x1xf32, #tpu.memory_space<smem>>, %arg5: memref<16x128xf32, #tpu.memory_space<vmem>>) attributes {dimension_semantics = [#tpu.dimension_semantics<parallel>, #tpu.dimension_semantics<arbitrary>], iteration_bounds = array<i64: 1, 1>, scalar_prefetch = 0 : i64, scratch_operands = 1 : i64, tpu.core_type = #tpu.core_type<tc>, window_params = [{transform_indices = @transform_0, window_bounds = array<i64: 16, 128>}, {transform_indices = @transform_1, window_bounds = array<i64: 16, 128>}, {transform_indices = @transform_2, window_bounds = array<i64: 1, 1>}]} {
    %c0_i32 = arith.constant 0 : i32
    %0 = arith.cmpi eq, %arg1, %c0_i32 : i32
    %1 = arith.extui %0 : i1 to i32
    %c0_i32_0 = arith.constant 0 : i32
    %2 = arith.cmpi ne, %1, %c0_i32_0 : i32
    scf.if %2 {
      %cst_13 = arith.constant 0.000000e+00 : f32
      %23 = vector.broadcast %cst_13 : f32 to vector<16x128xf32>
      %c0_14 = arith.constant 0 : index
      %c0_15 = arith.constant 0 : index
      %24 = vector.load %arg5[%c0_14, %c0_15] : memref<16x128xf32, #tpu.memory_space<vmem>>, vector<16x128xf32>
      tpu.vector_store %arg5[%c0_14, %c0_15], %23 {strides = array<i32>} : memref<16x128xf32, #tpu.memory_space<vmem>>, vector<16x128xf32>,
    } else {
    }
    %c0 = arith.constant 0 : index
    %c0_1 = arith.constant 0 : index
    %3 = vector.load %arg2[%c0, %c0_1] : memref<16x128xf32, #tpu.memory_space<vmem>>, vector<16x128xf32>
    %c0_2 = arith.constant 0 : index
    %c0_3 = arith.constant 0 : index
    %4 = vector.load %arg3[%c0_2, %c0_3] : memref<16x128xf32, #tpu.memory_space<vmem>>, vector<16x128xf32>
    %5 = arith.subf %3, %4 : vector<16x128xf32>
    %6 = math.absf %5 : vector<16x128xf32>
    %cst = arith.constant 1.000000e+00 : f32
    %7 = vector.broadcast %cst : f32 to vector<16x128xf32>
    %8 = arith.cmpf ole, %6, %7 : vector<16x128xf32>
    %cst_4 = arith.constant 5.000000e-01 : f32
    %9 = vector.broadcast %cst_4 : f32 to vector<16x128xf32>
    %10 = arith.mulf %9, %5 : vector<16x128xf32>
    %11 = arith.mulf %10, %5 : vector<16x128xf32>
    %cst_5 = arith.constant 5.000000e-01 : f32
    %12 = vector.broadcast %cst_5 : f32 to vector<16x128xf32>
    %13 = arith.subf %6, %12 : vector<16x128xf32>
    %cst_6 = arith.constant 1.000000e+00 : f32
    %14 = vector.broadcast %cst_6 : f32 to vector<16x128xf32>
    %15 = arith.mulf %14, %13 : vector<16x128xf32>
    %16 = arith.select %8, %11, %15 : vector<16x128xi1>, vector<16x128xf32>
    %c0_7 = arith.constant 0 : index
    %c0_8 = arith.constant 0 : index
    %17 = vector.load %arg5[%c0_7, %c0_8] : memref<16x128xf32, #tpu.memory_space<vmem>>, vector<16x128xf32>
    %18 = arith.addf %17, %16 : vector<16x128xf32>
    %c0_9 = arith.constant 0 : index
    %c0_10 = arith.constant 0 : index
    %19 = vector.load %arg5[%c0_9, %c0_10] : memref<16x128xf32, #tpu.memory_space<vmem>>, vector<16x128xf32>
    tpu.vector_store %arg5[%c0_9, %c0_10], %18 {strides = array<i32>} : memref<16x128xf32, #tpu.memory_space<vmem>>, vector<16x128xf32>,
    %c0_i32_11 = arith.constant 0 : i32
    %20 = arith.cmpi eq, %arg1, %c0_i32_11 : i32
    %21 = arith.extui %20 : i1 to i32
    %c0_i32_12 = arith.constant 0 : i32
    %22 = arith.cmpi ne, %21, %c0_i32_12 : i32
    scf.if %22 {
      %c0_13 = arith.constant 0 : index
      %c0_14 = arith.constant 0 : index
      %23 = vector.load %arg5[%c0_13, %c0_14] : memref<16x128xf32, #tpu.memory_space<vmem>>, vector<16x128xf32>
      %24 = vector.shape_cast %23 : vector<16x128xf32> to vector<1x16x128xf32>
      %cst_15 = arith.constant dense<0.000000e+00> : vector<1xf32>
      %25 = vector.multi_reduction <add>, %24, %cst_15 [1, 2] : vector<1x16x128xf32> to vector<1xf32>
      %26 = vector.shape_cast %25 : vector<1xf32> to vector<1x1x1xf32>
      %27 = vector.extract %26[0, 0, 0] : f32 from vector<1x1x1xf32>
      %cst_16 = arith.constant 2.048000e+03 : f32
      %28 = arith.divf %27, %cst_16 : f32
      %c0_17 = arith.constant 0 : index
      %c0_18 = arith.constant 0 : index
      %29 = memref.load %arg4[%c0_17, %c0_18] : memref<1x1xf32, #tpu.memory_space<smem>>
      memref.store %28, %arg4[%c0_17, %c0_18] : memref<1x1xf32, #tpu.memory_space<smem>>
    } else {
    }
    return
  }
  func.func @transform_0(%arg0: i32, %arg1: i32) -> (i32, i32) {
    %c1_i32 = arith.constant 1 : i32
    %0 = arith.muli %arg0, %c1_i32 : i32
    %1 = arith.addi %0, %arg1 : i32
    %c0_i32 = arith.constant 0 : i32
    %c0_i32_0 = arith.constant 0 : i32
    return %1, %c0_i32 : i32, i32
  }
  func.func @transform_1(%arg0: i32, %arg1: i32) -> (i32, i32) {
    %c1_i32 = arith.constant 1 : i32
    %0 = arith.muli %arg0, %c1_i32 : i32
    %1 = arith.addi %0, %arg1 : i32
    %c0_i32 = arith.constant 0 : i32
    %c0_i32_0 = arith.constant 0 : i32
    return %1, %c0_i32 : i32, i32
  }
  func.func @transform_2(%arg0: i32, %arg1: i32) -> (i32, i32) {
    %c0_i32 = arith.constant 0 : i32
    %c0_i32_0 = arith.constant 0 : i32
    return %arg0, %c0_i32 : i32, i32
  }
}

</mosaic_0001>

<bundles_post_ra>
// kernel: tpu_custom_call.1
= control target key start
LH: loop header
LB: loop body
LE: loop exit
PB: predicated region body
PF: predicated region fallthrough
CT: control target
= control target key end

     0   :  { %7 = vsyncpa [#allocation4], 0  ;;  %s209_s0 = inlined_call_operand.hbm [shape: f32[16,128], index: 0, kind: input, shape index: {}]   ;;  %s210_s1 = inlined_call_operand.hbm [shape: f32[16,128], index: 1, kind: input, shape index: {}]   ;;  %s211_s2 = inlined_call_operand.hbm [shape: f32[1,1], index: 2, kind: output, shape index: {}]  }
   0x1   :  { %8 = vsyncpa [#allocation7], 0 }
   0x2   :  { %9 = vsyncpa [#allocation5], 0  ;;  %s180_s9 = smov [#allocation3]  }
   0x3   :  { %s19_s10 = sshll.u32 %s180_s9, 4  ;;  %s20_s10 = int_to_ptr.vmem [resolvable:$true] %s19_s10 }
   0x4   :  { %s134_s11 = scalar_lea.vmem %s20_s10, 256  ;;  %p139_p1 = scmp.lt.s32.totalorder %s20_s10, %s20_s10 }
   0x5   :  { %p135_p0 = scmp.ne.s32.totalorder %s20_s10, %s134_s11  ;;  %p140_p2 = scmp.lt.s32.totalorder %s134_s11, %s134_s11 }
   0x7   :  { %p141_p3 = por %p140_p2, %p139_p1 }
   0x9   :  { %p142_p4 = pnand %p141_p3, %p135_p0 }
   0xb   :  { %145 = shalt.err (!%p142_p4)
}
   0xc   :  { %s181_s12 = smov 128   ;;  %s182_s13 = smov 8  }
   0xd   :  { %25 = dma.hbm_to_vmem [thread:$0]  %s209_s0, 256, %s20_s10, [#allocation4], %s181_s12, %s181_s12, %s182_s13  }
   0xe   :  { %s183_s16 = smov [#allocation6]  }
   0xf   :  { %s35_s17 = sshll.u32 %s183_s16, 4  ;;  %s36_s17 = int_to_ptr.vmem [resolvable:$true] %s35_s17 }
  0x10   :  { %s154_s18 = scalar_lea.vmem %s36_s17, 256  ;;  %p159_p6 = scmp.lt.s32.totalorder %s36_s17, %s36_s17 }
  0x11   :  { %p155_p5 = scmp.ne.s32.totalorder %s36_s17, %s154_s18  ;;  %p160_p7 = scmp.lt.s32.totalorder %s154_s18, %s154_s18 }
  0x13   :  { %p161_p8 = por %p160_p7, %p159_p6 }
  0x15   :  { %p162_p9 = pnand %p161_p8, %p155_p5 }
  0x17   :  { %165 = shalt.err (!%p162_p9)
}
  0x18   :  { %41 = dma.hbm_to_vmem [thread:$0]  %s210_s1, 256, %s36_s17, [#allocation7], %s181_s12, %s181_s12, %s182_s13  }
  0x19   :  { %174 = dma.done.wait [#allocation4], 256  }
  0x1a   :  { %175 = vsyncadd [#allocation4], 4294967040 }
  0x1b   :  { %176 = dma.done.wait [#allocation7], 256  }
  0x1c   :  { %177 = vsyncadd [#allocation7], 4294967040  ;;  %v58_v0 = vld [vmem:[#allocation3] sm:$0xff]  ;;  %v59_v1 = vld [vmem:[#allocation3 + $0x8] sm:$0xff]  ;;  %s184_s21 = smov [#allocation8]  }
  0x1d   :  { %v60_v2 = vld [vmem:[#allocation6] sm:$0xff]  ;;  %v61_v3 = vld [vmem:[#allocation6 + $0x8] sm:$0xff] }
  0x1e   :  { %v62_v4 = vsub.f32 %v58_v0, %v60_v2  ;;  %v63_v5 = vsub.f32 %v59_v1, %v61_v3 }
  0x20   :  { %v64_v6 = vand.u32 2147483647, %v62_v4  ;;  %v68_v7 = vmul.f32 0.5, %v62_v4  ;;  %v65_v8 = vand.u32 2147483647, %v63_v5  ;;  %v69_v9 = vmul.f32 0.5, %v63_v5 }
  0x22   :  { %vm66_vm0 = vcmp.le.f32.partialorder %v64_v6, 1.0  ;;  %v70_v10 = vmul.f32 %v68_v7, %v62_v4  ;;  %v117_v11 = vadd.f32 -0.5, %v64_v6  ;;  %vm67_vm1 = vcmp.le.f32.partialorder %v65_v8, 1.0 }
  0x23   :  { %v71_v12 = vmul.f32 %v69_v9, %v63_v5  ;;  %v118_v13 = vadd.f32 -0.5, %v65_v8 }
  0x24   :  { %v74_v14 = vsel %vm66_vm0, %v70_v10, %v117_v11 }
  0x25   :  { %v75_v15 = vsel %vm67_vm1, %v71_v12, %v118_v13 }
  0x26   :  { %v87_v16 = vadd.f32 %v75_v15, %v74_v14 }
  0x28   :  { %88 = vadd.xlane.f32.xlu0 %v87_v16 }
  0xb1   :  { %v89_v17 = vpop.xlane.xlu0 %88 }
  0xb2   :  { %v90_v18 = vrot.slane %v89_v17, 4 }
  0xb4   :  { %v91_v19 = vadd.f32 %v90_v18, %v89_v17 }
  0xb6   :  { %v92_v20 = vrot.slane %v91_v19, 2 }
  0xb8   :  { %v93_v21 = vadd.f32 %v92_v20, %v91_v19 }
  0xba   :  { %v94_v22 = vrot.slane %v93_v21, 1 }
  0xbc   :  { %v95_v23 = vadd.f32 %v94_v22, %v93_v21 }
  0xbe   :  { %119 = vpush %v95_v23 }
  0xef   :  { %s120_s0 = spop %119 }
  0xf0   :  { %s99_s1 = smul.f32 0.00048828125, %s120_s0 }
  0xf2   :  { %101 = sst [smem:[#allocation8]] %s99_s1 }
  0xf3   :  { %109 = dma.smem_to_hbm %s184_s21, 16, %s211_s2, [#allocation5]  }
  0xf4   :  { %178 = dma.done.wait [#allocation5], 16  }
  0xf5   :  { %179 = vsyncadd [#allocation5], 4294967280 }
  0xf6   :  { %113 = sfence }
  0xf7   :  { %114 = vsyncpa [#allocation4], 1 }
  0xf8   :  { %115 = vsyncpa [#allocation7], 1 }
  0xf9   :  { %116 = vsyncpa [#allocation5], 1 }

</bundles_post_ra>
